<compile_context>
chip_gen: v6e
topology: v6e:2x2x1
jax: 0.10.0
libtpu: 0.0.40
codegen_flags: <defaults>
</compile_context>

<pallas_src>
import jax
import jax.numpy as jnp
from jax.experimental import pallas as pl
from jax.experimental.pallas import tpu as pltpu


def cross_attention3_kernel(
    x_ref, xfold_ref,
    dw1_ref, db1_ref, dw2_ref, db2_ref, dw3_ref, db3_ref,
    lw1t_ref, lb1t_ref, lw2t_ref, lb2t_ref, lw3t_ref, lb3t_ref,
    o_ref,
):
    tb, L, C = x_ref.shape
    f32 = jnp.float32
    cdt = dw1_ref.dtype            # matmul compute dtype (f32 by default)

    x = x_ref[...]                 # (tb, L, C), original dtype

    # ---------------- D branch: MLP over the channel axis C -----------------
    # Flatten batch*tokens into a tall MXU M dim when L keeps sublane packing.
    if L % 8 == 0:
        xd = x.reshape(tb * L, C).astype(cdt)
    else:
        xd = x.astype(cdt)         # (tb, L, C); jnp.dot contracts the last axis
    h = jnp.tanh(jnp.dot(xd, dw1_ref[...], preferred_element_type=f32)
                 + db1_ref[...])
    h = jnp.tanh(jnp.dot(h.astype(cdt), dw2_ref[...],
                         preferred_element_type=f32) + db2_ref[...])
    attn_d = jax.nn.sigmoid(jnp.dot(h.astype(cdt), dw3_ref[...],
                                    preferred_element_type=f32) + db3_ref[...])
    attn_d = attn_d.reshape(tb, L, C)                       # f32

    # ------- L branch: MLP over the token axis L, batched & transposed ------
    # xfold[:, b*C:(b+1)*C] == x[b] (host-folded), so one matmul per layer
    # covers the whole block with lane-dense N = tb*C; the (out, 1) biases
    # broadcast once per step along the lane axis.
    xf = xfold_ref[0]                                        # (L, tb*C), cdt
    t = jnp.tanh(jnp.dot(lw1t_ref[...], xf, preferred_element_type=f32)
                 + lb1t_ref[...])
    t = jnp.tanh(jnp.dot(lw2t_ref[...], t.astype(cdt),
                         preferred_element_type=f32) + lb2t_ref[...])
    attn_lt = jax.nn.sigmoid(jnp.dot(lw3t_ref[...], t.astype(cdt),
                                     preferred_element_type=f32)
                             + lb3t_ref[...])                # (L, tb*C), f32
    # Un-fold back to (tb, L, C).  attn_lt[:, b*C:(b+1)*C] == attnL[b]^T.
    attn_lt = jnp.swapaxes(attn_lt.reshape(L, tb, C), 0, 1)

    # Fused gate, single coalesced store:
    #   out = x*attnD + (x^T*attnL)^T = x * (attnD + attnL^T)
    o_ref[...] = (x.astype(f32) * (attn_d + attn_lt)).astype(o_ref.dtype)


def _pick_block_b(B, L, C, *, x_itemsize, cdt_itemsize, out_itemsize,
                  weight_bytes, vmem_budget_bytes=12 * 1024 * 1024,
                  target_rows=1024, min_grid_steps=2):
    """Largest divisor of B whose block fits a conservative VMEM budget,
    keeping >= min_grid_steps grid steps (v7x dual TensorCore) when B allows."""
    divisors = [d for d in range(1, B + 1) if B % d == 0]
    usable = [d for d in divisors if B // d >= min_grid_steps] or [1]
    best = 1
    for tb in usable:
        blk = tb * L * C
        approx = (weight_bytes                      # single-buffered constants
                  + 2 * blk * x_itemsize            # x block, double-buffered
                  + 2 * blk * cdt_itemsize          # folded-x block, 2 bufs
                  + 2 * blk * out_itemsize          # out block, 2 bufs
                  + 8 * blk * 4)                    # live f32 activations
        if approx > vmem_budget_bytes:
            break
        best = tb
        if tb * L >= target_rows:                   # enough MXU rows per step
            break
    return best


def cross_attention3(x, params, *, compute_dtype=jnp.float32, block_b=None,
                     vmem_budget_bytes=12 * 1024 * 1024):
    """x: (B, Mh, Mw, C). params: dict from init_params. Returns (B, Mh, Mw, C)."""
    B, Mh, Mw, C = x.shape
    L = Mh * Mw
    out_dtype = x.dtype
    cdt = jnp.dtype(compute_dtype)
    f32 = jnp.float32

    # --- host-side (one-time) weight preparation -----------------------------
    dw1 = params["dw1"].astype(cdt); db1 = params["db1"].astype(f32)
    dw2 = params["dw2"].astype(cdt); db2 = params["db2"].astype(f32)
    dw3 = params["dw3"].astype(cdt); db3 = params["db3"].astype(f32)
    # L branch: pre-transpose to (out, in) so the kernel computes W @ x, and
    # reshape biases to (out, 1) so they broadcast along the lane (N) axis.
    lw1t = params["lw1"].T.astype(cdt); lb1t = params["lb1"].T.astype(f32)
    lw2t = params["lw2"].T.astype(cdt); lb2t = params["lb2"].T.astype(f32)
    lw3t = params["lw3"].T.astype(cdt); lb3t = params["lb3"].T.astype(f32)
    wts = (dw1, db1, dw2, db2, dw3, db3, lw1t, lb1t, lw2t, lb2t, lw3t, lb3t)
    weight_bytes = sum(int(w.size) * w.dtype.itemsize for w in wts)

    if block_b is None:
        block_b = _pick_block_b(
            B, L, C,
            x_itemsize=x.dtype.itemsize, cdt_itemsize=cdt.itemsize,
            out_itemsize=jnp.dtype(out_dtype).itemsize,
            weight_bytes=weight_bytes, vmem_budget_bytes=vmem_budget_bytes)
    assert B % block_b == 0, "block_b must divide the batch size"
    n_blocks = B // block_b

    # x kept in its original dtype (the gate multiplies full-precision x);
    # the folded view feeds the batched L-branch matmuls lane-densely.
    xc = x.reshape(B, L, C)
    xfold = (xc.astype(cdt)
             .reshape(n_blocks, block_b, L, C)
             .transpose(0, 2, 1, 3)
             .reshape(n_blocks, L, block_b * C))

    def _const_spec(a):
        # Whole array, same block every grid step -> fetched once; single
        # buffer since it never changes (frees VMEM for larger x/out blocks).
        return pl.BlockSpec(a.shape, lambda i, n=a.ndim: (0,) * n,
                            pipeline_mode=pl.Buffered(1))

    x_spec = pl.BlockSpec((block_b, L, C), lambda i: (i, 0, 0))
    xfold_spec = pl.BlockSpec((1, L, block_b * C), lambda i: (i, 0, 0))
    o_spec = pl.BlockSpec((block_b, L, C), lambda i: (i, 0, 0))

    # VMEM limit derived from the same accounting, with headroom for
    # compiler temporaries; clamped to a range safe on v5e/v6e/v7x.
    blk = block_b * L * C
    est = (weight_bytes
           + 2 * blk * (x.dtype.itemsize + cdt.itemsize
                        + jnp.dtype(out_dtype).itemsize)
           + 8 * blk * 4)
    vmem_limit = int(min(max(2 * est, 32 * 1024 * 1024), 64 * 1024 * 1024))

    out = pl.pallas_call(
        cross_attention3_kernel,
        out_shape=jax.ShapeDtypeStruct((B, L, C), out_dtype),
        grid_spec=pltpu.PrefetchScalarGridSpec(
            num_scalar_prefetch=0,
            grid=(n_blocks,),
            in_specs=[x_spec, xfold_spec] + [_const_spec(a) for a in wts],
            out_specs=o_spec,
        ),
        compiler_params=pltpu.CompilerParams(
            dimension_semantics=("parallel",),
            vmem_limit_bytes=vmem_limit),
    )(xc, xfold, *wts)

    return out.reshape(B, Mh, Mw, C)


def init_params(key, dim, L):
    """Deterministic synthetic parameters; weights stored as (in, out)."""
    ks = jax.random.split(key, 12)
    s = 0.1

    def w(k, i, o):
        return s * jax.random.normal(k, (i, o), jnp.float32)

    def b(k, o):
        return s * jax.random.normal(k, (1, o), jnp.float32)

    return dict(
        dw1=w(ks[0], dim, dim // 2), db1=b(ks[1], dim // 2),
        dw2=w(ks[2], dim // 2, dim), db2=b(ks[3], dim),
        dw3=w(ks[4], dim, dim),      db3=b(ks[5], dim),
        lw1=w(ks[6], L, L // 2),     lb1=b(ks[7], L // 2),
        lw2=w(ks[8], L // 2, L),     lb2=b(ks[9], L),
        lw3=w(ks[10], L, L),         lb3=b(ks[11], L),
    )


def reference(x, p):
    """Pure-JAX f32 reference matching the PyTorch forward (dropout = identity)."""
    B, Mh, Mw, C = x.shape
    L = Mh * Mw
    f32 = jnp.float32

    def lin(a, w, b):
        return jnp.einsum("bij,jk->bik", a.astype(f32), w.astype(f32)) + b.astype(f32)

    xd = x.reshape(B, L, C).astype(f32)
    h = jnp.tanh(lin(xd, p["dw1"], p["db1"]))
    h = jnp.tanh(lin(h, p["dw2"], p["db2"]))
    attn_d = jax.nn.sigmoid(lin(h, p["dw3"], p["db3"]))

    xl = jnp.swapaxes(xd, 1, 2)                    # (B, C, L)
    g = jnp.tanh(lin(xl, p["lw1"], p["lb1"]))
    g = jnp.tanh(lin(g, p["lw2"], p["lb2"]))
    attn_l = jax.nn.sigmoid(lin(g, p["lw3"], p["lb3"]))

    out = xd * attn_d + jnp.swapaxes(xl * attn_l, 1, 2)
    return out.reshape(B, Mh, Mw, C).astype(x.dtype)


if __name__ == "__main__":
    # window_size = 2  ->  L = window_size**4 = 16  ->  Mh = Mw = window_size**2 = 4
    B, window_size, dim = 2, 2, 32
    Mh = Mw = window_size ** 2
    key = jax.random.PRNGKey(0)
    kx, kp = jax.random.split(key)
    x = jax.random.normal(kx, (B, Mh, Mw, dim), jnp.float32)
    params = init_params(kp, dim, Mh * Mw)

    fn = jax.jit(cross_attention3)
    out = jax.block_until_ready(fn(x, params))
    ref = reference(x, params)

    assert out.shape == x.shape
    assert jnp.allclose(out, ref, atol=1e-2, rtol=1e-2), (
        "mismatch vs f32 reference, max abs diff = "
        f"{float(jnp.max(jnp.abs(out - ref)))}")
    print("KERNEL_OK")
</pallas_src>

<mosaic_0001>
module attributes {stable_mosaic.version = 11 : i64} {
  func.func @cross_attention3_kernel(%arg0: i32, %arg1: memref<1x16x32xf32, #tpu.memory_space<vmem>>, %arg2: memref<1x16x32xf32, #tpu.memory_space<vmem>>, %arg3: memref<32x16xf32, #tpu.memory_space<vmem>>, %arg4: memref<1x16xf32, #tpu.memory_space<vmem>>, %arg5: memref<16x32xf32, #tpu.memory_space<vmem>>, %arg6: memref<1x32xf32, #tpu.memory_space<vmem>>, %arg7: memref<32x32xf32, #tpu.memory_space<vmem>>, %arg8: memref<1x32xf32, #tpu.memory_space<vmem>>, %arg9: memref<8x16xf32, #tpu.memory_space<vmem>>, %arg10: memref<8x1xf32, #tpu.memory_space<vmem>>, %arg11: memref<16x8xf32, #tpu.memory_space<vmem>>, %arg12: memref<16x1xf32, #tpu.memory_space<vmem>>, %arg13: memref<16x16xf32, #tpu.memory_space<vmem>>, %arg14: memref<16x1xf32, #tpu.memory_space<vmem>>, %arg15: memref<1x16x32xf32, #tpu.memory_space<vmem>>) attributes {dimension_semantics = [#tpu.dimension_semantics<parallel>], iteration_bounds = array<i64: 2>, scalar_prefetch = 0 : i64, scratch_operands = 0 : i64, tpu.core_type = #tpu.core_type<tc>, window_params = [{transform_indices = @transform_0, window_bounds = array<i64: 1, 16, 32>}, {transform_indices = @transform_1, window_bounds = array<i64: 1, 16, 32>}, {pipeline_mode = #tpu.pipeline_mode<synchronous>, transform_indices = @transform_2, window_bounds = array<i64: 32, 16>}, {pipeline_mode = #tpu.pipeline_mode<synchronous>, transform_indices = @transform_3, window_bounds = array<i64: 1, 16>}, {pipeline_mode = #tpu.pipeline_mode<synchronous>, transform_indices = @transform_4, window_bounds = array<i64: 16, 32>}, {pipeline_mode = #tpu.pipeline_mode<synchronous>, transform_indices = @transform_5, window_bounds = array<i64: 1, 32>}, {pipeline_mode = #tpu.pipeline_mode<synchronous>, transform_indices = @transform_6, window_bounds = array<i64: 32, 32>}, {pipeline_mode = #tpu.pipeline_mode<synchronous>, transform_indices = @transform_7, window_bounds = array<i64: 1, 32>}, {pipeline_mode = #tpu.pipeline_mode<synchronous>, transform_indices = @transform_8, window_bounds = array<i64: 8, 16>}, {pipeline_mode = #tpu.pipeline_mode<synchronous>, transform_indices = @transform_9, window_bounds = array<i64: 8, 1>}, {pipeline_mode = #tpu.pipeline_mode<synchronous>, transform_indices = @transform_10, window_bounds = array<i64: 16, 8>}, {pipeline_mode = #tpu.pipeline_mode<synchronous>, transform_indices = @transform_11, window_bounds = array<i64: 16, 1>}, {pipeline_mode = #tpu.pipeline_mode<synchronous>, transform_indices = @transform_12, window_bounds = array<i64: 16, 16>}, {pipeline_mode = #tpu.pipeline_mode<synchronous>, transform_indices = @transform_13, window_bounds = array<i64: 16, 1>}, {transform_indices = @transform_14, window_bounds = array<i64: 1, 16, 32>}]} {
    %c0 = arith.constant 0 : index
    %c0_0 = arith.constant 0 : index
    %c0_1 = arith.constant 0 : index
    %0 = vector.load %arg1[%c0, %c0_0, %c0_1] : memref<1x16x32xf32, #tpu.memory_space<vmem>>, vector<1x16x32xf32>
    %1 = vector.shape_cast %0 : vector<1x16x32xf32> to vector<16x32xf32>
    %c0_2 = arith.constant 0 : index
    %c0_3 = arith.constant 0 : index
    %2 = vector.load %arg3[%c0_2, %c0_3] : memref<32x16xf32, #tpu.memory_space<vmem>>, vector<32x16xf32>
    %cst = arith.constant dense<0.000000e+00> : vector<16x16xf32>
    %3 = tpu.matmul %1, %2, %cst {dimension_numbers = #tpu.dot_dimension_numbers<[1], [0], [0], [1], [0, 0, 1, 1], [], []>} : vector<16x32xf32>, vector<32x16xf32>, vector<16x16xf32> -> vector<16x16xf32>
    %c0_4 = arith.constant 0 : index
    %c0_5 = arith.constant 0 : index
    %4 = vector.load %arg4[%c0_4, %c0_5] : memref<1x16xf32, #tpu.memory_space<vmem>>, vector<1x16xf32>
    %5 = vector.broadcast %4 : vector<1x16xf32> to vector<16x16xf32>
    %6 = arith.addf %3, %5 : vector<16x16xf32>
    %7 = math.tanh %6 : vector<16x16xf32>
    %c0_6 = arith.constant 0 : index
    %c0_7 = arith.constant 0 : index
    %8 = vector.load %arg5[%c0_6, %c0_7] : memref<16x32xf32, #tpu.memory_space<vmem>>, vector<16x32xf32>
    %cst_8 = arith.constant dense<0.000000e+00> : vector<16x32xf32>
    %9 = tpu.matmul %7, %8, %cst_8 {dimension_numbers = #tpu.dot_dimension_numbers<[1], [0], [0], [1], [0, 0, 1, 1], [], []>} : vector<16x16xf32>, vector<16x32xf32>, vector<16x32xf32> -> vector<16x32xf32>
    %c0_9 = arith.constant 0 : index
    %c0_10 = arith.constant 0 : index
    %10 = vector.load %arg6[%c0_9, %c0_10] : memref<1x32xf32, #tpu.memory_space<vmem>>, vector<1x32xf32>
    %11 = vector.broadcast %10 : vector<1x32xf32> to vector<16x32xf32>
    %12 = arith.addf %9, %11 : vector<16x32xf32>
    %13 = math.tanh %12 : vector<16x32xf32>
    %c0_11 = arith.constant 0 : index
    %c0_12 = arith.constant 0 : index
    %14 = vector.load %arg7[%c0_11, %c0_12] : memref<32x32xf32, #tpu.memory_space<vmem>>, vector<32x32xf32>
    %cst_13 = arith.constant dense<0.000000e+00> : vector<16x32xf32>
    %15 = tpu.matmul %13, %14, %cst_13 {dimension_numbers = #tpu.dot_dimension_numbers<[1], [0], [0], [1], [0, 0, 1, 1], [], []>} : vector<16x32xf32>, vector<32x32xf32>, vector<16x32xf32> -> vector<16x32xf32>
    %c0_14 = arith.constant 0 : index
    %c0_15 = arith.constant 0 : index
    %16 = vector.load %arg8[%c0_14, %c0_15] : memref<1x32xf32, #tpu.memory_space<vmem>>, vector<1x32xf32>
    %17 = vector.broadcast %16 : vector<1x32xf32> to vector<16x32xf32>
    %18 = arith.addf %15, %17 : vector<16x32xf32>
    %19 = arith.negf %18 : vector<16x32xf32>
    %20 = math.exp %19 : vector<16x32xf32>
    %cst_16 = arith.constant 1.000000e+00 : f32
    %21 = vector.broadcast %cst_16 : f32 to vector<16x32xf32>
    %22 = arith.addf %21, %20 : vector<16x32xf32>
    %23 = arith.divf %21, %22 : vector<16x32xf32>
    %24 = vector.shape_cast %23 : vector<16x32xf32> to vector<1x16x32xf32>
    %c0_17 = arith.constant 0 : index
    %c0_18 = arith.constant 0 : index
    %c0_19 = arith.constant 0 : index
    %25 = vector.load %arg2[%c0_17, %c0_18, %c0_19] : memref<1x16x32xf32, #tpu.memory_space<vmem>>, vector<1x16x32xf32>
    %26 = vector.shape_cast %25 : vector<1x16x32xf32> to vector<16x32xf32>
    %c0_20 = arith.constant 0 : index
    %c0_21 = arith.constant 0 : index
    %27 = vector.load %arg9[%c0_20, %c0_21] : memref<8x16xf32, #tpu.memory_space<vmem>>, vector<8x16xf32>
    %cst_22 = arith.constant dense<0.000000e+00> : vector<8x32xf32>
    %28 = tpu.matmul %27, %26, %cst_22 {dimension_numbers = #tpu.dot_dimension_numbers<[1], [0], [0], [1], [0, 0, 1, 1], [], []>} : vector<8x16xf32>, vector<16x32xf32>, vector<8x32xf32> -> vector<8x32xf32>
    %c0_23 = arith.constant 0 : index
    %c0_24 = arith.constant 0 : index
    %29 = vector.load %arg10[%c0_23, %c0_24] : memref<8x1xf32, #tpu.memory_space<vmem>>, vector<8x1xf32>
    %30 = vector.broadcast %29 : vector<8x1xf32> to vector<8x32xf32>
    %31 = arith.addf %28, %30 : vector<8x32xf32>
    %32 = math.tanh %31 : vector<8x32xf32>
    %c0_25 = arith.constant 0 : index
    %c0_26 = arith.constant 0 : index
    %33 = vector.load %arg11[%c0_25, %c0_26] : memref<16x8xf32, #tpu.memory_space<vmem>>, vector<16x8xf32>
    %cst_27 = arith.constant dense<0.000000e+00> : vector<16x32xf32>
    %34 = tpu.matmul %33, %32, %cst_27 {dimension_numbers = #tpu.dot_dimension_numbers<[1], [0], [0], [1], [0, 0, 1, 1], [], []>} : vector<16x8xf32>, vector<8x32xf32>, vector<16x32xf32> -> vector<16x32xf32>
    %c0_28 = arith.constant 0 : index
    %c0_29 = arith.constant 0 : index
    %35 = vector.load %arg12[%c0_28, %c0_29] : memref<16x1xf32, #tpu.memory_space<vmem>>, vector<16x1xf32>
    %36 = vector.broadcast %35 : vector<16x1xf32> to vector<16x32xf32>
    %37 = arith.addf %34, %36 : vector<16x32xf32>
    %38 = math.tanh %37 : vector<16x32xf32>
    %c0_30 = arith.constant 0 : index
    %c0_31 = arith.constant 0 : index
    %39 = vector.load %arg13[%c0_30, %c0_31] : memref<16x16xf32, #tpu.memory_space<vmem>>, vector<16x16xf32>
    %cst_32 = arith.constant dense<0.000000e+00> : vector<16x32xf32>
    %40 = tpu.matmul %39, %38, %cst_32 {dimension_numbers = #tpu.dot_dimension_numbers<[1], [0], [0], [1], [0, 0, 1, 1], [], []>} : vector<16x16xf32>, vector<16x32xf32>, vector<16x32xf32> -> vector<16x32xf32>
    %c0_33 = arith.constant 0 : index
    %c0_34 = arith.constant 0 : index
    %41 = vector.load %arg14[%c0_33, %c0_34] : memref<16x1xf32, #tpu.memory_space<vmem>>, vector<16x1xf32>
    %42 = vector.broadcast %41 : vector<16x1xf32> to vector<16x32xf32>
    %43 = arith.addf %40, %42 : vector<16x32xf32>
    %44 = arith.negf %43 : vector<16x32xf32>
    %45 = math.exp %44 : vector<16x32xf32>
    %cst_35 = arith.constant 1.000000e+00 : f32
    %46 = vector.broadcast %cst_35 : f32 to vector<16x32xf32>
    %47 = arith.addf %46, %45 : vector<16x32xf32>
    %48 = arith.divf %46, %47 : vector<16x32xf32>
    %49 = vector.shape_cast %48 : vector<16x32xf32> to vector<16x1x32xf32>
    %50 = tpu.transpose %49, [1, 0, 2] : vector<16x1x32xf32> -> vector<1x16x32xf32>
    %51 = arith.addf %24, %50 : vector<1x16x32xf32>
    %52 = arith.mulf %0, %51 : vector<1x16x32xf32>
    %c0_36 = arith.constant 0 : index
    %c0_37 = arith.constant 0 : index
    %c0_38 = arith.constant 0 : index
    %53 = vector.load %arg15[%c0_36, %c0_37, %c0_38] : memref<1x16x32xf32, #tpu.memory_space<vmem>>, vector<1x16x32xf32>
    tpu.vector_store %arg15[%c0_36, %c0_37, %c0_38], %52 {strides = array<i32>} : memref<1x16x32xf32, #tpu.memory_space<vmem>>, vector<1x16x32xf32>,
    return
  }
  func.func @transform_0(%arg0: i32) -> (i32, i32, i32) {
    %c0_i32 = arith.constant 0 : i32
    %c0_i32_0 = arith.constant 0 : i32
    %c0_i32_1 = arith.constant 0 : i32
    return %arg0, %c0_i32, %c0_i32_0 : i32, i32, i32
  }
  func.func @transform_1(%arg0: i32) -> (i32, i32, i32) {
    %c0_i32 = arith.constant 0 : i32
    %c0_i32_0 = arith.constant 0 : i32
    %c0_i32_1 = arith.constant 0 : i32
    return %arg0, %c0_i32, %c0_i32_0 : i32, i32, i32
  }
  func.func @transform_2(%arg0: i32) -> (i32, i32) {
    %c0_i32 = arith.constant 0 : i32
    %c0_i32_0 = arith.constant 0 : i32
    %c0_i32_1 = arith.constant 0 : i32
    return %c0_i32, %c0_i32_0 : i32, i32
  }
  func.func @transform_3(%arg0: i32) -> (i32, i32) {
    %c0_i32 = arith.constant 0 : i32
    %c0_i32_0 = arith.constant 0 : i32
    %c0_i32_1 = arith.constant 0 : i32
    return %c0_i32, %c0_i32_0 : i32, i32
  }
  func.func @transform_4(%arg0: i32) -> (i32, i32) {
    %c0_i32 = arith.constant 0 : i32
    %c0_i32_0 = arith.constant 0 : i32
    %c0_i32_1 = arith.constant 0 : i32
    return %c0_i32, %c0_i32_0 : i32, i32
  }
  func.func @transform_5(%arg0: i32) -> (i32, i32) {
    %c0_i32 = arith.constant 0 : i32
    %c0_i32_0 = arith.constant 0 : i32
    %c0_i32_1 = arith.constant 0 : i32
    return %c0_i32, %c0_i32_0 : i32, i32
  }
  func.func @transform_6(%arg0: i32) -> (i32, i32) {
    %c0_i32 = arith.constant 0 : i32
    %c0_i32_0 = arith.constant 0 : i32
    %c0_i32_1 = arith.constant 0 : i32
    return %c0_i32, %c0_i32_0 : i32, i32
  }
  func.func @transform_7(%arg0: i32) -> (i32, i32) {
    %c0_i32 = arith.constant 0 : i32
    %c0_i32_0 = arith.constant 0 : i32
    %c0_i32_1 = arith.constant 0 : i32
    return %c0_i32, %c0_i32_0 : i32, i32
  }
  func.func @transform_8(%arg0: i32) -> (i32, i32) {
    %c0_i32 = arith.constant 0 : i32
    %c0_i32_0 = arith.constant 0 : i32
    %c0_i32_1 = arith.constant 0 : i32
    return %c0_i32, %c0_i32_0 : i32, i32
  }
  func.func @transform_9(%arg0: i32) -> (i32, i32) {
    %c0_i32 = arith.constant 0 : i32
    %c0_i32_0 = arith.constant 0 : i32
    %c0_i32_1 = arith.constant 0 : i32
    return %c0_i32, %c0_i32_0 : i32, i32
  }
  func.func @transform_10(%arg0: i32) -> (i32, i32) {
    %c0_i32 = arith.constant 0 : i32
    %c0_i32_0 = arith.constant 0 : i32
    %c0_i32_1 = arith.constant 0 : i32
    return %c0_i32, %c0_i32_0 : i32, i32
  }
  func.func @transform_11(%arg0: i32) -> (i32, i32) {
    %c0_i32 = arith.constant 0 : i32
    %c0_i32_0 = arith.constant 0 : i32
    %c0_i32_1 = arith.constant 0 : i32
    return %c0_i32, %c0_i32_0 : i32, i32
  }
  func.func @transform_12(%arg0: i32) -> (i32, i32) {
    %c0_i32 = arith.constant 0 : i32
    %c0_i32_0 = arith.constant 0 : i32
    %c0_i32_1 = arith.constant 0 : i32
    return %c0_i32, %c0_i32_0 : i32, i32
  }
  func.func @transform_13(%arg0: i32) -> (i32, i32) {
    %c0_i32 = arith.constant 0 : i32
    %c0_i32_0 = arith.constant 0 : i32
    %c0_i32_1 = arith.constant 0 : i32
    return %c0_i32, %c0_i32_0 : i32, i32
  }
  func.func @transform_14(%arg0: i32) -> (i32, i32, i32) {
    %c0_i32 = arith.constant 0 : i32
    %c0_i32_0 = arith.constant 0 : i32
    %c0_i32_1 = arith.constant 0 : i32
    return %arg0, %c0_i32, %c0_i32_0 : i32, i32, i32
  }
}

</mosaic_0001>

<bundles_post_ra>
// kernel: cross_attention3.1
= control target key start
LH: loop header
LB: loop body
LE: loop exit
PB: predicated region body
PF: predicated region fallthrough
CT: control target
= control target key end

     0   :  { %s1895_s0 = inlined_call_operand.vmem [shape: f32[2,16,32], index: 0, kind: input, shape index: {}, may-alias: {0,1}]   ;;  %s1896_s1 = inlined_call_operand.vmem [shape: f32[2,16,32], index: 1, kind: input, shape index: {}, may-alias: {0,1}]   ;;  %s1897_s2 = inlined_call_operand.vmem [shape: f32[32,16], index: 2, kind: input, shape index: {}]   ;;  %s1898_s3 = inlined_call_operand.vmem [shape: f32[1,16], index: 3, kind: input, shape index: {}]   ;;  %s1899_s4 = inlined_call_operand.vmem [shape: f32[16,32], index: 4, kind: input, shape index: {}]   ;;  %s1900_s5 = inlined_call_operand.vmem [shape: f32[1,32], index: 5, kind: input, shape index: {}]   ;;  %s1901_s6 = inlined_call_operand.vmem [shape: f32[32,32], index: 6, kind: input, shape index: {}]   ;;  %s1902_s7 = inlined_call_operand.vmem [shape: f32[1,32], index: 7, kind: input, shape index: {}]   ;;  %s1903_s8 = inlined_call_operand.vmem [shape: f32[8,16], index: 8, kind: input, shape index: {}]   ;;  %s1904_s9 = inlined_call_operand.vmem [shape: f32[8,1], index: 9, kind: input, shape index: {}]   ;;  %s1905_s10 = inlined_call_operand.vmem [shape: f32[16,8], index: 10, kind: input, shape index: {}]   ;;  %s1906_s11 = inlined_call_operand.vmem [shape: f32[16,1], index: 11, kind: input, shape index: {}]   ;;  %s1907_s12 = inlined_call_operand.vmem [shape: f32[16,16], index: 12, kind: input, shape index: {}]   ;;  %s1908_s13 = inlined_call_operand.vmem [shape: f32[16,1], index: 13, kind: input, shape index: {}]   ;;  %s1909_s14 = inlined_call_operand.hbm [shape: f32[2,16,32], index: 14, kind: output, shape index: {}]  }
   0x1   :  { %1914 = sst [smem:[#allocation9_spill]] %s1904_s9 }
   0x2   :  { %19 = vsyncpa [#allocation3], 0 }
   0x3   :  { %21 = vsyncpa [#allocation3 + $0x1], 0  ;;  %s1696_s29 = smov 0   ;;  %s1698_s30 = smov 0  }
   0x4   :  { %s1700_s15 = smov 0   ;;  %s1702_s16 = smov 0  }
   0x5 LB: > { %1915 = sst [smem:[#allocation5_spill]] %s1608_s15  ;;  %s1717_s17 = sadd.s32 4294967295, %s1612_s16   ;;  %s1612_s16 = sphi %s1702_s16, %s1923_s16   ;;  %s1608_s15 = sphi %s1700_s15, %s1925_s15   ;;  %s1604_s30 = sphi %s1698_s30, %s1927_s30   ;;  %s1600_s29 = sphi %s1696_s29, %s1926_s29  }
   0x6   : > { %s1362_s18 = sadd.s32 4294967294, %s1612_s16   ;;  %s1721_s19 = sadd.s32 1, %s1612_s16  }
   0x7   : > { %1916 = sst [smem:[#allocation6_spill]] %s1721_s19  ;;  %s338_s20 = sadd.s32 1, %s1608_s15 }
   0x8   : > { %s335_s21 = ssub.s32 %s1612_s16, %s1721_s19  ;;  %p348_p0 = scmp.ne.s32.totalorder %s1608_s15, %s1604_s30 }
   0x9   : > { %p336_p1 = scmp.eq.s32.totalorder %s335_s21, 0  ;;  %p349_p2 = scmp.eq.s32.totalorder %s1717_s17, 1 }
   0xa   : > { %p354_p3 = scmp.ne.s32.totalorder %s1604_s30, %s1600_s29  ;;  %p355_p4 = scmp.eq.s32.totalorder %s1362_s18, 1 }
   0xb   : > { %s1732_s22 = scalar_select %p336_p1, %s1608_s15, %s338_s20  }
   0xc   : > { %p1734_p5 = por %p349_p2, %p348_p0  ;;  %p1738_p6 = por %p355_p4, %p354_p3 }
   0xd   : > { %1917 = sst [smem:[#allocation7_spill]] %s1732_s22  ;;  %p1365_p7 = scmp.ge.s32.totalorder %s1612_s16, 1 }
   0xe   : > { %s1919_s24 = scalar_select %p1738_p6, 1, 0 }
   0xf   : > { %p425_p8 = scmp.lt.s32.totalorder %s1612_s16, 3 }
  0x10   : > { %1920 = sst [smem:[#allocation8_spill]] %s1919_s24 }
  0x11   : > { %p426_p9 = pnand %p1365_p7, %p425_p8 }
  0x12   : > { %p476_p10 = scmp.lt.s32.totalorder (!%p426_p9), %s1717_s17, 1  ;;  %s1921_s9 = sld [smem:[#allocation9_spill]] (!%p426_p9) }
  0x13   : > { %429 = sbr.rel (%p426_p9) target bundleno = 727 (0x2d7), region = 76  ;;  %s473_s22 = sand.u32 (!%p426_p9), 1, %s1604_s30  }
  0x14   : > { %s1366_s21 = sshll.u32 (!%p426_p9), %s473_s22, 4  ;;  %s1618_s28 = smov (!%p426_p9), [#allocation2]  }
  0x15   : > { %s475_s19 = scalar_lea.vmem (!%p426_p9), [#allocation2], %s1366_s21  ;;  %s1556_s18 = sshll.u32 (!%p426_p9), %s1618_s28, 4  ;;  %s1557_s18 = int_to_ptr.vmem [resolvable:$false] %s1556_s18 }
  0x16   : > { %s1288_s24 = sshll.u32 (!%p426_p9), %s475_s19, 4  ;;  %s1849_s24 = int_to_ptr.vmem [resolvable:$true] %s1288_s24 }
  0x17   : > { %p1559_p0 = scmp.lt.s32.totalorder (!%p426_p9), %s1849_s24, %s1557_s18 }
  0x18   : > { %v491_v0 = vld [vmem:[%s1897_s2 + $0x18] sm:$0xff]  ;;  %v490_v1 = vld [vmem:[%s1897_s2 + $0x10] sm:$0xff]  ;;  %v783_v2 = vld [vmem:[%s1921_s9] sm:$0xff]  ;;  %s477_s15 = scalar_select %p476_p10, %s1717_s17, 1  ;;  %v1614_v4 = vmov 0   ;;  %vm499_vm0 = vcmask 261120  }
  0x19   : > { %1427 = vmatprep.subr.mxu0 %v491_v0  ;;  %v489_v3 = vld [vmem:[%s1897_s2 + $0x8] sm:$0xff]  ;;  %1520 = vset.pattern.permute.xlu0 %v1614_v4  ;;  %v488_v5 = vld [vmem:[%s1897_s2] sm:$0xff]  ;;  %v1615_v10 = vmov 0.0   ;;  %vm1616_vm1 = vmmov 0   ;;  %vm592_vm2 = vcmask 130048   ;;  %vm877_vm3 = vcmask 64512  }
  0x1a   : > { %1428 = vmatpush3.msra.mxu0 %v491_v0  ;;  %786 = vperm.xlu0 %1520, %v783_v2   ;;  %s1398_s27 = sshll.u32 %s477_s15, 4  ;;  %v866_v6 = vld [vmem:[%s1906_s11 + $0x8] sm:$0xff]  ;;  %v782_v13 = vld [vmem:[%s1903_s8] sm:$0xff]  ;;  %v679_v32 = vld [vmem:[%s1901_s6 + $0x18] sm:$0xff]  ;;  %s1400_s15 = sshll.u32 %s1717_s17, 8 }
  0x1b   : > { %1429 = vmatprep.subr.mxu0 %v490_v1  ;;  %1521 = vset.pattern.permute.xlu1 %v1614_v4  ;;  %s480_s20 = scalar_lea.vmem %s1895_s0, %s1398_s27  ;;  %s485_s9 = scalar_lea.vmem %s1896_s1, %s1398_s27  ;;  %v964_v12 = vld [vmem:[%s1908_s13 + $0x8] sm:$0xff]  ;;  %v583_v15 = vld [vmem:[%s1899_s4] sm:$0xff]  ;;  %v678_v33 = vld [vmem:[%s1901_s6 + $0x10] sm:$0xff] }
  0x1c   : > { %1430 = vmatpush3.msra.mxu0 %v490_v1  ;;  %v1770_v7 = vld [vmem:[%s480_s20] sm:$0xff]  ;;  %v1772_v8 = vld [vmem:[%s480_s20 + $0x8] sm:$0xff]  ;;  %s1847_s27 = scalar_lea.hbm %s1909_s14, %s1400_s15  ;;  %s1855_s17 = scalar_lea.sflag [#allocation3], %s473_s22 }
  0x1d   : > { %1431 = vmatprep.subr.mxu0 %v489_v3  ;;  %1435 = vmatprep.mubr.msk.f32.mxu0 %vm499_vm0, %v1770_v7  ;;  %v781_v9 = vld [vmem:[%s485_s9 + $0x8] sm:$0xff]  ;;  %v780_v11 = vld [vmem:[%s485_s9] sm:$0xff]  ;;  %s1552_s9 = scalar_lea.vmem %s1849_s24, 256  ;;  %s1558_s20 = scalar_lea.vmem %s1557_s18, 512 }
  0x1e   : > { %1432 = vmatpush3.msra.mxu0 %v489_v3  ;;  %874 = vperm.xlu0 %1520, %v866_v6   ;;  %v584_v14 = vld [vmem:[%s1899_s4 + $0x8] sm:$0xff]  ;;  %v863_v16 = vld [vmem:[%s1905_s10] sm:$0xff]  ;;  %p1553_p11 = scmp.ne.s32.totalorder %s1849_s24, %s1552_s9  ;;  %p1560_p1 = scmp.lt.s32.totalorder %s1558_s20, %s1552_s9 }
  0x1f   : > { %1433 = vmatprep.subr.mxu0 %v488_v5  ;;  %1438 = vmatprep.subr.mxu1 %v584_v14  ;;  %v865_v17 = vld [vmem:[%s1906_s11] sm:$0xff]  ;;  %v864_v31 = vld [vmem:[%s1905_s10 + $0x8] sm:$0xff] }
  0x20   : > { %1434 = vmatpush3.msra.mxu0 %v488_v5  ;;  %1439 = vmatpush3.msra.mxu1 %v584_v14  ;;  %v963_v18 = vld [vmem:[%s1908_s13] sm:$0xff]  ;;  %v677_v34 = vld [vmem:[%s1901_s6 + $0x8] sm:$0xff]  ;;  %p1554_p12 = pnand %p1553_p11, %p1734_p5  ;;  %p1561_p2 = por %p1560_p1, %p1559_p0 }
  0x21   : > { %1436 = vmatmul.mubr.msk.f32.vlgmr.msra.gmra.mxu0 %vm499_vm0, %v1772_v8  ;;  %1456 = vmatprep.subr.mxu0 %v1615_v10  ;;  %v1371_v19 = vld [vmem:[%s1898_s3] ss:$0 sm:$0xff]  ;;  %v962_v52 = vld [vmem:[%s1907_s12 + $0x8] sm:$0xff] }
  0x22   : > { %1457 = vmatpush3.msra.mxu0 %v781_v9  ;;  %1460 = vmatprep.mubr.msk.f32.mxu0 %vm1616_vm1, %v1615_v10  ;;  %v676_v35 = vld [vmem:[%s1901_s6] sm:$0xff]  ;;  %p1555_p13 = pneg %p1554_p12 }
  0x23   : > { %1458 = vmatprep.subr.mxu0 %v1615_v10  ;;  %972 = vperm.xlu0 %1520, %v964_v12   ;;  %v1374_v36 = vld [vmem:[%s1900_s5] ss:$0 sm:$0xff]  ;;  %v1617_v10 = vmov 1966171168   ;;  %v1074_v12 = vlaneseq }
  0x24   : > { %1459 = vmatpush3.msra.mxu0 %v780_v11  ;;  %1440 = vmatprep.subr.mxu1 %v583_v15  ;;  %v961_v49 = vld [vmem:[%s1907_s12] sm:$0xff]  ;;  %v1072_v11 = vunpack.c.l.s4 %v1617_v10  ;;  %p1562_p3 = pnand %p1561_p2, %p1555_p13 }
  0x25   : > { %1461 = vmatmul.mubr.msk.f32.vlgmr.msra.gmra.mxu0 %vm592_vm2, %v782_v13  ;;  %1441 = vmatpush3.msra.mxu1 %v583_v15  ;;  %v1377_v63 = vld [vmem:[%s1902_s7] ss:$0 sm:$0xff]  ;;  %v1075_v14 = vshrl.u32 %v1074_v12, 7 }
  0x26   : > { %1465 = vmatprep.mubr.msk.f32.mxu0 %vm877_vm3, %v863_v16  ;;  %869 = vperm.xlu1 %1521, %v865_v17   ;;  %v1073_v13 = vunpack.c.0.s8 %v1072_v11 }
  0x27   : > { %1445 = vmatprep.subr.mxu1 %v679_v32 }
  0x28   : > { %v1076_v16 = vsub.s32 %v1073_v13, %v1075_v14 }
  0x2a   : > { %967 = vperm.xlu1 %1521, %v963_v18  }
  0x95   : > { %v787_v24 = vpop.permute.xlu0 %786 }
  0x99   : > { %v875_v40 = vpop.permute.xlu0 %874 }
  0x9e   : > { %v973_v55 = vpop.permute.xlu0 %972 }
  0xa1   : > { %v870_v44 = vpop.permute.xlu1 %869 }
  0xa5   : > { %v968_v58 = vpop.permute.xlu1 %967 }
  0xe1   : > { %v1437_v20 = vpop.f32.mrf.mxu0 }
  0xe2   : > { %v578_v21 = vadd.f32 %v1437_v20, %v1371_v19 }
  0xe3   : > { %v572_v22 = vpop.f32.mrf.mxu0 }
  0xe4   : > { %v573_v23 = vadd.f32 %v1371_v19, %v572_v22 }
  0xe5   : > { %v858_v25 = vpop.f32.mrf.mxu0 }
  0xe6   : > { %1522 = vtanh.f32 %v573_v23  ;;  %v859_v26 = vadd.f32 %v858_v25, %v787_v24 }
  0xe7   : > { %1524 = vtanh.f32 %v578_v21  ;;  %v1462_v27 = vpop.f32.mrf.mxu0 }
  0xe8   : > { %1526 = vtanh.f32 %v859_v26 }
  0xf3   : > { %v1523_v28 = vpop.eup %1522 }
  0xf4   : > { %v1525_v29 = vpop.eup %1524  ;;  %1442 = vmatprep.mubr.msk.f32.mxu1 %vm592_vm2, %v1523_v28 }
  0xf5   : > { %v1527_v30 = vpop.eup %1526  ;;  %1443 = vmatmul.mubr.msk.f32.vlgmr.msra.gmra.mxu1 %vm592_vm2, %v1525_v29 }
  0xf6   : > { %1463 = vmatprep.subr.mxu0 %v1527_v30  ;;  %1446 = vmatpush3.msra.mxu1 %v679_v32 }
  0xf7   : > { %1464 = vmatpush3.msra.mxu0 %v1527_v30  ;;  %1447 = vmatprep.subr.mxu1 %v678_v33 }
  0xf8   : > { %1466 = vmatmul.mubr.msk.f32.vlgmr.msra.gmra.mxu0 %vm877_vm3, %v864_v31  ;;  %1448 = vmatpush3.msra.mxu1 %v678_v33 }
  0xf9   : > { %1449 = vmatprep.subr.mxu1 %v677_v34 }
  0xfa   : > { %1450 = vmatpush3.msra.mxu1 %v677_v34 }
  0xfb   : > { %1451 = vmatprep.subr.mxu1 %v676_v35 }
  0xfc   : > { %1452 = vmatpush3.msra.mxu1 %v676_v35 }
 0x1b5   : > { %v1444_v37 = vpop.f32.mrf.mxu1 }
 0x1b6   : > { %v671_v38 = vadd.f32 %v1444_v37, %v1374_v36 }
 0x1b7   : > { %v665_v39 = vpop.f32.mrf.mxu1 }
 0x1b8   : > { %v666_v41 = vadd.f32 %v1374_v36, %v665_v39  ;;  %v1467_v42 = vpop.f32.mrf.mxu0  ;;  %1528 = vtanh.f32 %v671_v38 }
 0x1b9   : > { %v956_v43 = vadd.f32 %v1467_v42, %v875_v40 }
 0x1ba   : > { %1530 = vtanh.f32 %v666_v41  ;;  %v950_v45 = vpop.f32.mrf.mxu0 }
 0x1bb   : > { %1532 = vtanh.f32 %v956_v43  ;;  %v951_v46 = vadd.f32 %v950_v45, %v870_v44 }
 0x1bd   : > { %1534 = vtanh.f32 %v951_v46 }
 0x1c5   : > { %v1529_v47 = vpop.eup %1528 }
 0x1c7   : > { %v1531_v48 = vpop.eup %1530 }
 0x1c8   : > { %v1533_v50 = vpop.eup %1532  ;;  %1453 = vmatprep.mubr.msk.f32.mxu1 %vm499_vm0, %v1531_v48 }
 0x1c9   : > { %1454 = vmatmul.mubr.msk.f32.vlgmr.msra.gmra.mxu1 %vm499_vm0, %v1529_v47  ;;  %1468 = vmatprep.subr.mxu1 %v1533_v50 }
 0x1ca   : > { %v1535_v51 = vpop.eup %1534  ;;  %1469 = vmatpush3.msra.mxu1 %v1533_v50  ;;  %1472 = vmatprep.mubr.msk.f32.mxu1 %vm592_vm2, %v961_v49 }
 0x1cb   : > { %1470 = vmatprep.subr.mxu1 %v1535_v51 }
 0x1cc   : > { %1471 = vmatpush3.msra.mxu1 %v1535_v51 }
 0x1cd   : > { %1473 = vmatmul.mubr.msk.f32.vlgmr.msra.gmra.mxu1 %vm592_vm2, %v962_v52 }
 0x289   : > { %v1455_v53 = vpop.f32.mrf.mxu1 }
 0x28a   : > { %v765_v0 = vadd.f32 %v1455_v53, %v1377_v63 }
 0x28b   : > { %v759_v54 = vpop.f32.mrf.mxu1 }
 0x28c   : > { %v1381_v1 = vmul.f32 -1.442695, %v765_v0  ;;  %v760_v2 = vadd.f32 %v1377_v63, %v759_v54 }
 0x28d   : > { %v1474_v56 = vpop.f32.mrf.mxu1 }
 0x28e   : > { %v1053_v57 = vadd.f32 %v1474_v56, %v973_v55  ;;  %v1380_v4 = vmul.f32 -1.442695, %v760_v2 }
 0x28f   : > { %v1047_v59 = vpop.f32.mrf.mxu1 }
 0x290   : > { %v1388_v60 = vmul.f32 -1.442695, %v1053_v57  ;;  %v1048_v61 = vadd.f32 %v1047_v59, %v968_v58 }
 0x292   : > { %1536 = vpow2.f32 %v1388_v60  ;;  %v1387_v62 = vmul.f32 -1.442695, %v1048_v61 }
 0x294   : > { %1538 = vpow2.f32 %v1387_v62 }
 0x295   : > { %1540 = vpow2.f32 %v1381_v1 }
 0x29f   : > { %v1537_v3 = vpop.eup %1536 }
 0x2a0   : > { %v1063_v5 = vadd.f32 1.0, %v1537_v3 }
 0x2a1   : > { %v1539_v6 = vpop.eup %1538 }
 0x2a2   : > { %1542 = vrcp.f32 %v1063_v5  ;;  %v1062_v9 = vadd.f32 1.0, %v1539_v6  ;;  %v1541_v15 = vpop.eup %1540 }
 0x2a3   : > { %1544 = vpow2.f32 %v1380_v4  ;;  %v775_v18 = vadd.f32 1.0, %v1541_v15 }
 0x2a4   : > { %1546 = vrcp.f32 %v1062_v9 }
 0x2a5   : > { %1548 = vrcp.f32 %v775_v18 }
 0x2af   : > { %v1543_v17 = vpop.eup %1542 }
 0x2b0   : > { %v1545_v19 = vpop.eup %1544  ;;  %v1119_v20 = vcombine.high %v1543_v17, %v1543_v17  ;;  %v1126_v21 = vrot.slane %v1543_v17, %v1076_v16 }
 0x2b1   : > { %v1547_v22 = vpop.eup %1546  ;;  %v774_v26 = vadd.f32 1.0, %v1545_v19 }
 0x2b2   : > { %v1133_v23 = vrot.slane %v1119_v20, %v1076_v16  ;;  %v1134_v24 = vcombine.high %v1126_v21, %v1126_v21  ;;  %v1070_v25 = vcombine.high %v1547_v22, %v1547_v22  ;;  %v1077_v27 = vrot.slane %v1547_v22, %v1076_v16  ;;  %v1549_v62 = vpop.eup %1548 }
 0x2b3   : > { %v1142_v29 = vrot.slane %v1126_v21, %v1076_v16  ;;  %1550 = vrcp.f32 %v774_v26 }
 0x2b4   : > { %v1135_v28 = vcombine.high %v1133_v23, %v1133_v23  ;;  %v1156_v30 = vrot.slane %v1134_v24, %v1076_v16  ;;  %v1084_v31 = vrot.slane %v1070_v25, %v1076_v16  ;;  %v1149_v32 = vrot.slane %v1133_v23, %v1076_v16 }
 0x2b5   : > { %v1085_v33 = vcombine.high %v1077_v27, %v1077_v27  ;;  %v1093_v38 = vrot.slane %v1077_v27, %v1076_v16 }
 0x2b6   : > { %v1163_v34 = vrot.slane %v1135_v28, %v1076_v16  ;;  %v1217_v35 = vcombine.low %v1142_v29, %v1156_v30  ;;  %v1391_v36 = vcombine.high %v1142_v29, %v1156_v30  ;;  %v1086_v37 = vcombine.high %v1084_v31, %v1084_v31 }
 0x2b7   : > { %v1107_v39 = vrot.slane %v1085_v33, %v1076_v16  ;;  %v1100_v44 = vrot.slane %v1084_v31, %v1076_v16 }
 0x2b8   : > { %v1219_v40 = vcombine.low %v1149_v32, %v1163_v34  ;;  %v1392_v41 = vcombine.high %v1149_v32, %v1163_v34  ;;  %v1227_v42 = vrot.slane %v1217_v35, %v1076_v16  ;;  %v1234_v43 = vrot.slane %v1391_v36, %v1076_v16 }
 0x2b9   : > { %v1114_v45 = vrot.slane %v1086_v37, %v1076_v16  ;;  %v1168_v46 = vcombine.low %v1093_v38, %v1107_v39  ;;  %v1389_v47 = vcombine.high %v1093_v38, %v1107_v39 }
 0x2ba   : > { %v1241_v48 = vrot.slane %v1219_v40, %v1076_v16  ;;  %v1248_v49 = vrot.slane %v1392_v41, %v1076_v16  ;;  %v1249_v50 = vcombine.low %v1227_v42, %v1234_v43 }
 0x2bb   : > { %v1170_v51 = vcombine.low %v1100_v44, %v1114_v45  ;;  %v1390_v52 = vcombine.high %v1100_v44, %v1114_v45  ;;  %v1178_v53 = vrot.slane %v1168_v46, %v1076_v16  ;;  %v1185_v54 = vrot.slane %v1389_v47, %v1076_v16 }
 0x2bc   : > { %v1250_v55 = vcombine.low %v1241_v48, %v1248_v49  ;;  %v1257_v59 = vrot.slane %v1249_v50, %v1076_v16 }
 0x2bd   : > { %v1192_v56 = vrot.slane %v1170_v51, %v1076_v16  ;;  %v1199_v57 = vrot.slane %v1390_v52, %v1076_v16  ;;  %v1200_v58 = vcombine.low %v1178_v53, %v1185_v54 }
 0x2be   : > { %v1264_v60 = vrot.slane %v1250_v55, %v1076_v16 }
 0x2bf   : > { %v1201_v61 = vcombine.low %v1192_v56, %v1199_v57  ;;  %v1208_v0 = vrot.slane %v1200_v58, %v1076_v16 }
 0x2c0   : > { %v1265_v63 = vcombine.low %v1257_v59, %v1264_v60  ;;  %v1551_v4 = vpop.eup %1550 }
 0x2c1   : > { %v1215_v1 = vrot.slane %v1201_v61, %v1076_v16 }
 0x2c2   : > { %v1269_v2 = vadd.f32 %v1549_v62, %v1265_v63 }
 0x2c3   : > { %v1216_v3 = vcombine.low %v1208_v0, %v1215_v1 }
 0x2c4   : > { %v1271_v5 = vmul.f32 %v1269_v2, %v1772_v8 }
 0x2c5   : > { %v1268_v6 = vadd.f32 %v1551_v4, %v1216_v3 }
 0x2c6   : > { %1273 = vst.msk [vmem:[%s475_s19 + $0x8] sm:$0xff] %vm499_vm0, %v1271_v5 }
 0x2c7   : > { %v1270_v9 = vmul.f32 %v1268_v6, %v1770_v7 }
 0x2c9   : > { %1272 = vst.msk [vmem:[%s475_s19] sm:$0xff] %vm499_vm0, %v1270_v9 }
 0x2ca   : > { %1565 = shalt.err (!%p1562_p3)
}
 0x2cb   : > { %s1566_s22 = scalar_lea.hbm %s1847_s27, 256  ;;  %s1570_s19 = scalar_lea.hbm %s1909_s14, 512 }
 0x2cc   : > { %p1567_p4 = scmp.ne.s32.totalorder %s1847_s27, %s1566_s22  ;;  %p1571_p9 = scmp.lt.s32.totalorder %s1847_s27, %s1909_s14 }
 0x2cd   : > { %p1572_p10 = scmp.lt.s32.totalorder %s1570_s19, %s1566_s22 }
 0x2ce   : > { %p1568_p7 = pnand %p1567_p4, %p1734_p5 }
 0x2cf   : > { %p1573_p11 = por %p1572_p10, %p1571_p9 }
 0x2d0   : > { %p1569_p8 = pneg %p1568_p7 }
 0x2d2   : > { %p1574_p12 = pnand %p1573_p11, %p1569_p8 }
 0x2d4   : > { %1577 = shalt.err (!%p1574_p12)
}
 0x2d5   : > { %s1619_s9 = smov 128   ;;  %s1620_s28 = smov 8  }
 0x2d6   : > { %1475 = dma.vmem_to_hbm [thread:$0]  (%p1734_p5), %s1849_s24, 256, %s1847_s27, %s1855_s17, %s1619_s9, %s1619_s9, %s1620_s28  }
 0x2d7 PF: > { %p1481_p13 = scmp.ge.s32.totalorder %s1612_s16, 2  ;;  %s1303_s20 = sand.u32 1, %s1600_s29  }
 0x2d8   : > { %s1304_s22 = scalar_lea.sflag [#allocation3], %s1303_s20 }
 0x2d9   : > { %p1478_p0 = pnand %p1481_p13, %p1738_p6 }
 0x2db   : > { %p1479_p1 = pneg %p1478_p0 }
 0x2dd   : > { %1595 = dma.done.wait (%p1479_p1), %s1304_s22, 256  }
 0x2de   : > { %1597 = vsyncadd (%p1479_p1), %s1304_s22, 4294967040  ;;  %s1923_s16 = sld [smem:[#allocation6_spill]]  ;;  %s1926_s29 = smov %s1604_s30 }
 0x2df   : > { %s1924_s21 = sld [smem:[#allocation5_spill]] }
 0x2e0   : > { %s1925_s15 = sld [smem:[#allocation7_spill]] }
 0x2e4   : > { %p24_p2 = scmp.ge.s32.totalorder %s1923_s16, 4  }
 0x2e5   : > { %s1927_s30 = smov %s1924_s21 }
 0x2e6   :  { %26 = sbr.rel (!%p24_p2) target bundleno = 5 (0x5), region = 114 }
 0x2eb   :  { %1309 = vsyncpa [#allocation3], 1 }
 0x2ec   :  { %1311 = vsyncpa [#allocation3 + $0x1], 1 }

</bundles_post_ra>
